<compile_context>
chip_gen: v7x
topology: tpu7x:2x2x1
jax: 0.10.0
libtpu: 0.0.40
codegen_flags: <defaults>
</compile_context>

<pallas_src>
import math
from functools import partial

import jax
import jax.numpy as jnp
from jax.experimental import pallas as pl
from jax.experimental.pallas import tpu as pltpu


def _round_up(x, m):
    return ((x + m - 1) // m) * m


# ---------------------------------------------------------------------------
# Fused stacked-GRU kernel: grid over layers, activation carried in VMEM.
# ---------------------------------------------------------------------------
def _stacked_gru_kernel(gx_ref, h0_ref, w_ref, b_ref, out_ref, carry_ref, *, hp):
    """One grid step == one GRU layer.

    gx_ref   : (Bp, 4*Hp) f32      precomputed layer-0 x @ W_ih (gate columns)
    h0_ref   : (1, Bp, Hp)         this layer's initial hidden state
    w_ref    : (1, 2*Hp, 4*Hp) bf16 rows [0:Hp]=input weights, [Hp:2Hp]=hidden
    b_ref    : (1, 1, 4*Hp) f32    [b_ir+b_hr | b_iz+b_hz | b_in | b_hn]
    out_ref  : (1, Bp, Hp)         this layer's new hidden state
    carry_ref: (Bp, Hp) bf16       previous layer's output (VMEM-resident)
    """
    layer = pl.program_id(0)

    # Layer 0 has no in-kernel previous-layer input (its x @ W_ih arrives via
    # gx_ref); zero the carry so the first dot contributes exactly 0.
    @pl.when(layer == 0)
    def _():
        carry_ref[...] = jnp.zeros_like(carry_ref)

    h = h0_ref[0].astype(jnp.float32)                       # (Bp, Hp)

    w = w_ref[0]                                            # (2*Hp, 4*Hp) bf16
    # Gate pre-activations: [ r_total | z_total | n_input | n_hidden ]
    g = (jnp.dot(carry_ref[...], w[:hp], preferred_element_type=jnp.float32)
         + jnp.dot(h.astype(jnp.bfloat16), w[hp:],
                   preferred_element_type=jnp.float32)
         + b_ref[0])

    # Layer 0 only: add the externally computed x-contribution.
    g = g + (layer == 0).astype(jnp.float32) * gx_ref[...]

    r = jax.nn.sigmoid(g[:, 0 * hp:1 * hp])
    z = jax.nn.sigmoid(g[:, 1 * hp:2 * hp])
    n = jnp.tanh(g[:, 2 * hp:3 * hp] + r * g[:, 3 * hp:4 * hp])
    h_new = n + z * (h - n)                                 # == (1-z)*n + z*h

    out_ref[0] = h_new.astype(out_ref.dtype)
    # TODO(synk): inter-layer dropout would be applied here (identity in eval).
    carry_ref[...] = h_new.astype(carry_ref.dtype)          # next layer's input


# ---------------------------------------------------------------------------
# Parameter init (PyTorch GRUCell layout) and packing into the fused layout.
# ---------------------------------------------------------------------------
def init_stacked_gru_params(key, num_layers, input_size, hidden_size,
                            dtype=jnp.float32):
    """PyTorch-style params: w_ih (3H, in), w_hh (3H, H), b_ih/b_hh (3H,)."""
    params = []
    bound = 1.0 / math.sqrt(hidden_size)
    in_sz = input_size
    for _ in range(num_layers):
        key, k1, k2, k3, k4 = jax.random.split(key, 5)
        params.append({
            "w_ih": jax.random.uniform(k1, (3 * hidden_size, in_sz), dtype, -bound, bound),
            "w_hh": jax.random.uniform(k2, (3 * hidden_size, hidden_size), dtype, -bound, bound),
            "b_ih": jax.random.uniform(k3, (3 * hidden_size,), dtype, -bound, bound),
            "b_hh": jax.random.uniform(k4, (3 * hidden_size,), dtype, -bound, bound),
        })
        in_sz = hidden_size
    return params


def pack_stacked_gru_params(raw_params, input_size, hidden_size):
    """Pack per-layer weights into a lane-aligned fused (bf16) layout.

    Returns:
      w_cat: (L, 2*Hp, 4*Hp) bf16  rows [0:Hp]=input(=prev layer out) weights
             (zero for layer 0), rows [Hp:2Hp]=hidden weights; gate columns
             [0:Hp]=r, [Hp:2Hp]=z, [2Hp:3Hp]=n_in, [3Hp:4Hp]=n_hidden.
      b_cat: (L, 1, 4*Hp) f32      [b_ir+b_hr | b_iz+b_hz | b_in | b_hn]
      w_in0: (input_size, 4*Hp) bf16  layer-0 input weights in gate-column
             layout (x-contribution is computed outside the kernel).
    """
    H = hidden_size
    Hp = _round_up(H, 128)
    Kp = 2 * Hp
    Ws, Bs = [], []
    for l, p in enumerate(raw_params):
        w_ih, w_hh = p["w_ih"], p["w_hh"]
        b_ih, b_hh = p["b_ih"], p["b_hh"]

        W = jnp.zeros((Kp, 4 * Hp), jnp.float32)
        if l > 0:
            # previous-layer-output (width H) weights -> rows [0:H]
            W = W.at[:H, 0:H].set(w_ih[0:H].T)
            W = W.at[:H, Hp:Hp + H].set(w_ih[H:2 * H].T)
            W = W.at[:H, 2 * Hp:2 * Hp + H].set(w_ih[2 * H:3 * H].T)
        # hidden-state weights -> rows [Hp:Hp+H]
        W = W.at[Hp:Hp + H, 0:H].set(w_hh[0:H].T)
        W = W.at[Hp:Hp + H, Hp:Hp + H].set(w_hh[H:2 * H].T)
        W = W.at[Hp:Hp + H, 3 * Hp:3 * Hp + H].set(w_hh[2 * H:3 * H].T)

        b = jnp.zeros((1, 4 * Hp), jnp.float32)
        b = b.at[0, 0:H].set(b_ih[0:H] + b_hh[0:H])
        b = b.at[0, Hp:Hp + H].set(b_ih[H:2 * H] + b_hh[H:2 * H])
        b = b.at[0, 2 * Hp:2 * Hp + H].set(b_ih[2 * H:3 * H])
        b = b.at[0, 3 * Hp:3 * Hp + H].set(b_hh[2 * H:3 * H])

        Ws.append(W)
        Bs.append(b)

    w_cat = jnp.stack(Ws).astype(jnp.bfloat16)
    b_cat = jnp.stack(Bs)                                   # f32 (tiny)

    # Layer-0 input weights in gate-column layout (no n_hidden contribution).
    w_ih0 = raw_params[0]["w_ih"]                           # (3H, input_size)
    w_in0 = jnp.zeros((input_size, 4 * Hp), jnp.float32)
    w_in0 = w_in0.at[:, 0:H].set(w_ih0[0:H].T)
    w_in0 = w_in0.at[:, Hp:Hp + H].set(w_ih0[H:2 * H].T)
    w_in0 = w_in0.at[:, 2 * Hp:2 * Hp + H].set(w_ih0[2 * H:3 * H].T)
    return w_cat, b_cat, w_in0.astype(jnp.bfloat16)


# ---------------------------------------------------------------------------
# Forward pass: one fused pallas_call for the whole stack.
# ---------------------------------------------------------------------------
@jax.jit
def stacked_gru_forward(w_cat, b_cat, w_in0, inputs, hidden):
    """
    w_cat : (L, 2*Hp, 4*Hp) bf16,  b_cat: (L, 1, 4*Hp) f32,
    w_in0 : (input_size, 4*Hp) bf16
    inputs: (B, input_size)   one timestep
    hidden: (L, B, H)         initial hidden state per layer
    returns (last layer output (B, H), stacked new hidden (L, B, H))
    """
    L, Kp, four_hp = w_cat.shape
    Hp = four_hp // 4
    B, _ = inputs.shape
    H = hidden.shape[-1]
    Bp = _round_up(max(B, 8), 8)

    # Layer-0 input contribution (tiny XLA matmul), gate-column layout, padded.
    gx = jnp.dot(inputs.astype(jnp.bfloat16), w_in0,
                 preferred_element_type=jnp.float32)         # (B, 4*Hp) f32
    gx_pad = jnp.zeros((Bp, four_hp), jnp.float32).at[:B].set(gx)

    # Zero-pad hidden to (L, Bp, Hp); zero pad rows/lanes keep the matmul exact.
    h_pad = jnp.zeros((L, Bp, Hp), hidden.dtype).at[:, :B, :H].set(hidden)

    h_itm = jnp.dtype(hidden.dtype).itemsize
    # Scoped-VMEM budget: double-buffered W/b/h0/out blocks + resident gx +
    # carry scratch + headroom.  Raised when H is large; never below 32 MiB.
    vmem_bytes = (2 * Kp * four_hp * 2                       # W blocks (bf16) x2
                  + 2 * four_hp * 4                          # bias blocks x2
                  + 2 * 2 * Bp * Hp * h_itm                  # h0 + out blocks x2
                  + Bp * four_hp * 4                         # gx (resident)
                  + Bp * Hp * 2                              # carry scratch
                  + (2 << 20))                               # headroom
    vmem_limit = int(min(max(vmem_bytes, 32 << 20), 96 << 20))

    out = pl.pallas_call(
        partial(_stacked_gru_kernel, hp=Hp),
        out_shape=jax.ShapeDtypeStruct((L, Bp, Hp), hidden.dtype),
        grid_spec=pltpu.PrefetchScalarGridSpec(
            num_scalar_prefetch=0,
            grid=(L,),
            in_specs=[
                pl.BlockSpec((Bp, four_hp), lambda l: (0, 0)),        # gx (layer 0)
                pl.BlockSpec((1, Bp, Hp), lambda l: (l, 0, 0)),       # per-layer h0
                pl.BlockSpec((1, Kp, four_hp), lambda l: (l, 0, 0)),  # per-layer W
                pl.BlockSpec((1, 1, four_hp), lambda l: (l, 0, 0)),   # per-layer b
            ],
            out_specs=pl.BlockSpec((1, Bp, Hp), lambda l: (l, 0, 0)),
            scratch_shapes=[pltpu.VMEM((Bp, Hp), jnp.bfloat16)],      # layer carry
        ),
        compiler_params=pltpu.CompilerParams(
            dimension_semantics=("arbitrary",),       # layer axis is sequential
            vmem_limit_bytes=vmem_limit),
    )(gx_pad, h_pad, w_cat, b_cat)

    h_1 = out[:, :B, :H]
    # TODO(synk): inter-layer dropout is identity here (inference semantics).
    return h_1[-1], h_1


# ---------------------------------------------------------------------------
# Self-check
# ---------------------------------------------------------------------------
if __name__ == "__main__":
    num_layers = 2
    input_size = 16
    hidden_size = 32
    batch = 4
    dropout = 0.1  # identity in this inference kernel

    key = jax.random.PRNGKey(0)
    kp, kx, kh = jax.random.split(key, 3)

    raw_params = init_stacked_gru_params(kp, num_layers, input_size, hidden_size)
    w_cat, b_cat, w_in0 = pack_stacked_gru_params(raw_params, input_size, hidden_size)

    inputs = jax.random.normal(kx, (batch, input_size), jnp.float32)
    hidden = jax.random.normal(kh, (num_layers, batch, hidden_size), jnp.float32)

    out, h_1 = stacked_gru_forward(w_cat, b_cat, w_in0, inputs, hidden)
    jax.block_until_ready((out, h_1))

    # Pure-JAX reference (PyTorch GRUCell formula, f32)
    def ref_cell(x, h, p):
        gi = x @ p["w_ih"].T + p["b_ih"]
        gh = h @ p["w_hh"].T + p["b_hh"]
        H = h.shape[-1]
        r = jax.nn.sigmoid(gi[:, :H] + gh[:, :H])
        z = jax.nn.sigmoid(gi[:, H:2 * H] + gh[:, H:2 * H])
        n = jnp.tanh(gi[:, 2 * H:] + r * gh[:, 2 * H:])
        return (1.0 - z) * n + z * h

    x_ref = inputs
    hs_ref = []
    for i in range(num_layers):
        x_ref = ref_cell(x_ref, hidden[i], raw_params[i])
        hs_ref.append(x_ref)
    h_1_ref = jnp.stack(hs_ref, axis=0)

    assert out.shape == (batch, hidden_size)
    assert h_1.shape == (num_layers, batch, hidden_size)
    # bf16 weight storage -> ~1e-2 tolerance vs the f32 reference.
    assert jnp.allclose(out, x_ref, atol=2e-2), "last-layer output mismatch"
    assert jnp.allclose(h_1, h_1_ref, atol=2e-2), "stacked hidden mismatch"

    print("KERNEL_OK")
</pallas_src>

<mosaic_0001>
module attributes {stable_mosaic.version = 11 : i64} {
  func.func @_stacked_gru_kernel(%arg0: i32, %arg1: memref<8x512xf32, #tpu.memory_space<vmem>>, %arg2: memref<1x8x128xf32, #tpu.memory_space<vmem>>, %arg3: memref<1x256x512xbf16, #tpu.memory_space<vmem>>, %arg4: memref<1x1x512xf32, #tpu.memory_space<vmem>>, %arg5: memref<1x8x128xf32, #tpu.memory_space<vmem>>, %arg6: memref<8x128xbf16, #tpu.memory_space<vmem>>) attributes {dimension_semantics = [#tpu.dimension_semantics<arbitrary>], iteration_bounds = array<i64: 2>, scalar_prefetch = 0 : i64, scratch_operands = 1 : i64, tpu.core_type = #tpu.core_type<tc>, window_params = [{pipeline_mode = #tpu.pipeline_mode<synchronous>, transform_indices = @transform_0, window_bounds = array<i64: 8, 512>}, {transform_indices = @transform_1, window_bounds = array<i64: 1, 8, 128>}, {transform_indices = @transform_2, window_bounds = array<i64: 1, 256, 512>}, {transform_indices = @transform_3, window_bounds = array<i64: 1, 1, 512>}, {transform_indices = @transform_4, window_bounds = array<i64: 1, 8, 128>}]} {
    %c0_i32 = arith.constant 0 : i32
    %0 = arith.cmpi eq, %arg0, %c0_i32 : i32
    %1 = arith.extui %0 : i1 to i32
    %c0_i32_0 = arith.constant 0 : i32
    %2 = arith.cmpi ne, %1, %c0_i32_0 : i32
    scf.if %2 {
      %cst_22 = arith.constant 0.000000e+00 : bf16
      %50 = vector.broadcast %cst_22 : bf16 to vector<8x128xbf16>
      %c0_23 = arith.constant 0 : index
      %c0_24 = arith.constant 0 : index
      %51 = vector.load %arg6[%c0_23, %c0_24] : memref<8x128xbf16, #tpu.memory_space<vmem>>, vector<8x128xbf16>
      tpu.vector_store %arg6[%c0_23, %c0_24], %50 {strides = array<i32>} : memref<8x128xbf16, #tpu.memory_space<vmem>>, vector<8x128xbf16>,
    } else {
    }
    %c0 = arith.constant 0 : index
    %c0_1 = arith.constant 0 : index
    %c0_2 = arith.constant 0 : index
    %3 = vector.load %arg2[%c0, %c0_1, %c0_2] : memref<1x8x128xf32, #tpu.memory_space<vmem>>, vector<1x8x128xf32>
    %4 = vector.shape_cast %3 : vector<1x8x128xf32> to vector<8x128xf32>
    %c0_3 = arith.constant 0 : index
    %c0_4 = arith.constant 0 : index
    %c0_5 = arith.constant 0 : index
    %5 = vector.load %arg3[%c0_3, %c0_4, %c0_5] : memref<1x256x512xbf16, #tpu.memory_space<vmem>>, vector<1x256x512xbf16>
    %6 = vector.shape_cast %5 : vector<1x256x512xbf16> to vector<256x512xbf16>
    %c0_6 = arith.constant 0 : index
    %c0_7 = arith.constant 0 : index
    %7 = vector.load %arg6[%c0_6, %c0_7] : memref<8x128xbf16, #tpu.memory_space<vmem>>, vector<8x128xbf16>
    %8 = vector.extract_strided_slice %6 {offsets = [0, 0], sizes = [128, 512], strides = [1, 1]} : vector<256x512xbf16> to vector<128x512xbf16>
    %cst = arith.constant dense<0.000000e+00> : vector<8x512xf32>
    %9 = tpu.matmul %7, %8, %cst {dimension_numbers = #tpu.dot_dimension_numbers<[1], [0], [0], [1], [0, 0, 1, 1], [], []>} : vector<8x128xbf16>, vector<128x512xbf16>, vector<8x512xf32> -> vector<8x512xf32>
    %10 = arith.truncf %4 : vector<8x128xf32> to vector<8x128xbf16>
    %11 = vector.extract_strided_slice %6 {offsets = [128, 0], sizes = [128, 512], strides = [1, 1]} : vector<256x512xbf16> to vector<128x512xbf16>
    %cst_8 = arith.constant dense<0.000000e+00> : vector<8x512xf32>
    %12 = tpu.matmul %10, %11, %cst_8 {dimension_numbers = #tpu.dot_dimension_numbers<[1], [0], [0], [1], [0, 0, 1, 1], [], []>} : vector<8x128xbf16>, vector<128x512xbf16>, vector<8x512xf32> -> vector<8x512xf32>
    %13 = arith.addf %9, %12 : vector<8x512xf32>
    %c0_9 = arith.constant 0 : index
    %c0_10 = arith.constant 0 : index
    %c0_11 = arith.constant 0 : index
    %14 = vector.load %arg4[%c0_9, %c0_10, %c0_11] : memref<1x1x512xf32, #tpu.memory_space<vmem>>, vector<1x1x512xf32>
    %15 = vector.shape_cast %14 : vector<1x1x512xf32> to vector<1x512xf32>
    %16 = vector.broadcast %15 : vector<1x512xf32> to vector<8x512xf32>
    %17 = arith.addf %13, %16 : vector<8x512xf32>
    %c0_i32_12 = arith.constant 0 : i32
    %18 = arith.cmpi eq, %arg0, %c0_i32_12 : i32
    %19 = arith.extui %18 : i1 to i32
    %20 = arith.sitofp %19 : i32 to f32
    %c0_13 = arith.constant 0 : index
    %c0_14 = arith.constant 0 : index
    %21 = vector.load %arg1[%c0_13, %c0_14] : memref<8x512xf32, #tpu.memory_space<vmem>>, vector<8x512xf32>
    %22 = vector.broadcast %20 : f32 to vector<8x512xf32>
    %23 = arith.mulf %22, %21 : vector<8x512xf32>
    %24 = arith.addf %17, %23 : vector<8x512xf32>
    %25 = vector.extract_strided_slice %24 {offsets = [0, 0], sizes = [8, 128], strides = [1, 1]} : vector<8x512xf32> to vector<8x128xf32>
    %26 = arith.negf %25 : vector<8x128xf32>
    %27 = math.exp %26 : vector<8x128xf32>
    %cst_15 = arith.constant 1.000000e+00 : f32
    %28 = vector.broadcast %cst_15 : f32 to vector<8x128xf32>
    %29 = arith.addf %28, %27 : vector<8x128xf32>
    %30 = arith.divf %28, %29 : vector<8x128xf32>
    %31 = vector.extract_strided_slice %24 {offsets = [0, 128], sizes = [8, 128], strides = [1, 1]} : vector<8x512xf32> to vector<8x128xf32>
    %32 = arith.negf %31 : vector<8x128xf32>
    %33 = math.exp %32 : vector<8x128xf32>
    %cst_16 = arith.constant 1.000000e+00 : f32
    %34 = vector.broadcast %cst_16 : f32 to vector<8x128xf32>
    %35 = arith.addf %34, %33 : vector<8x128xf32>
    %36 = arith.divf %34, %35 : vector<8x128xf32>
    %37 = vector.extract_strided_slice %24 {offsets = [0, 256], sizes = [8, 128], strides = [1, 1]} : vector<8x512xf32> to vector<8x128xf32>
    %38 = vector.extract_strided_slice %24 {offsets = [0, 384], sizes = [8, 128], strides = [1, 1]} : vector<8x512xf32> to vector<8x128xf32>
    %39 = arith.mulf %30, %38 : vector<8x128xf32>
    %40 = arith.addf %37, %39 : vector<8x128xf32>
    %41 = math.tanh %40 : vector<8x128xf32>
    %42 = arith.subf %4, %41 : vector<8x128xf32>
    %43 = arith.mulf %36, %42 : vector<8x128xf32>
    %44 = arith.addf %41, %43 : vector<8x128xf32>
    %c0_17 = arith.constant 0 : index
    %c0_18 = arith.constant 0 : index
    %c0_19 = arith.constant 0 : index
    %45 = vector.load %arg5[%c0_17, %c0_18, %c0_19] : memref<1x8x128xf32, #tpu.memory_space<vmem>>, vector<1x8x128xf32>
    %46 = vector.shape_cast %45 : vector<1x8x128xf32> to vector<8x128xf32>
    %47 = vector.shape_cast %44 : vector<8x128xf32> to vector<1x8x128xf32>
    tpu.vector_store %arg5[%c0_17, %c0_18, %c0_19], %47 {strides = array<i32>} : memref<1x8x128xf32, #tpu.memory_space<vmem>>, vector<1x8x128xf32>,
    %48 = arith.truncf %44 : vector<8x128xf32> to vector<8x128xbf16>
    %c0_20 = arith.constant 0 : index
    %c0_21 = arith.constant 0 : index
    %49 = vector.load %arg6[%c0_20, %c0_21] : memref<8x128xbf16, #tpu.memory_space<vmem>>, vector<8x128xbf16>
    tpu.vector_store %arg6[%c0_20, %c0_21], %48 {strides = array<i32>} : memref<8x128xbf16, #tpu.memory_space<vmem>>, vector<8x128xbf16>,
    return
  }
  func.func @transform_0(%arg0: i32) -> (i32, i32) {
    %c0_i32 = arith.constant 0 : i32
    %c0_i32_0 = arith.constant 0 : i32
    %c0_i32_1 = arith.constant 0 : i32
    return %c0_i32, %c0_i32_0 : i32, i32
  }
  func.func @transform_1(%arg0: i32) -> (i32, i32, i32) {
    %c0_i32 = arith.constant 0 : i32
    %c0_i32_0 = arith.constant 0 : i32
    %c0_i32_1 = arith.constant 0 : i32
    return %arg0, %c0_i32, %c0_i32_0 : i32, i32, i32
  }
  func.func @transform_2(%arg0: i32) -> (i32, i32, i32) {
    %c0_i32 = arith.constant 0 : i32
    %c0_i32_0 = arith.constant 0 : i32
    %c0_i32_1 = arith.constant 0 : i32
    return %arg0, %c0_i32, %c0_i32_0 : i32, i32, i32
  }
  func.func @transform_3(%arg0: i32) -> (i32, i32, i32) {
    %c0_i32 = arith.constant 0 : i32
    %c0_i32_0 = arith.constant 0 : i32
    %c0_i32_1 = arith.constant 0 : i32
    return %arg0, %c0_i32, %c0_i32_0 : i32, i32, i32
  }
  func.func @transform_4(%arg0: i32) -> (i32, i32, i32) {
    %c0_i32 = arith.constant 0 : i32
    %c0_i32_0 = arith.constant 0 : i32
    %c0_i32_1 = arith.constant 0 : i32
    return %arg0, %c0_i32, %c0_i32_0 : i32, i32, i32
  }
}

</mosaic_0001>

<bundles_post_ra>
// kernel: stacked_gru_forward.1
= control target key start
LH: loop header
LB: loop body
LE: loop exit
PB: predicated region body
PF: predicated region fallthrough
CT: control target
= control target key end

     0   :  { %9 = vsyncpa [#allocation4], 0  ;;  %s1499_s0 = inlined_call_operand.vmem [shape: f32[8,512], index: 0, kind: input, shape index: {}]   ;;  %s1500_s1 = inlined_call_operand.vmem [shape: f32[2,8,128], index: 1, kind: input, shape index: {}]   ;;  %s1501_s2 = inlined_call_operand.hbm [shape: bf16[2,256,512], index: 2, kind: input, shape index: {}]   ;;  %s1502_s3 = inlined_call_operand.vmem [shape: f32[2,1,512], index: 3, kind: input, shape index: {}]   ;;  %s1503_s4 = inlined_call_operand.vmem [shape: f32[2,8,128], index: 4, kind: output, shape index: {}]  }
   0x1   :  { %11 = vsyncpa [#allocation4 + $0x1], 0  ;;  %s1284_s15 = smov 0   ;;  %s1286_s16 = smov 0  }
   0x2   :  { %s1288_s17 = smov 0   ;;  %s1290_s18 = smov 0  }
   0x3 LB: > { %s1303_s19 = sadd.s32 4294967295, %s1252_s18   ;;  %s1306_s20 = sadd.s32 1, %s1252_s18   ;;  %s1252_s18 = sphi %s1290_s18, %s1512_s18   ;;  %s1248_s17 = sphi %s1288_s17, %s1511_s17   ;;  %s1244_s16 = sphi %s1286_s16, %s1510_s16   ;;  %s1240_s15 = sphi %s1284_s15, %s1509_s15  }
   0x4   : > { %s68_s21 = ssub.s32 %s1252_s18, %s1306_s20  ;;  %s71_s22 = sadd.s32 1, %s1248_s17 }
   0x5   : > { %p69_p0 = scmp.eq.s32.totalorder %s68_s21, 0  ;;  %p78_p1 = scmp.ne.s32.totalorder %s1248_s17, %s1244_s16 }
   0x6   : > { %p79_p2 = scmp.eq.s32.totalorder %s1252_s18, 0  ;;  %p84_p3 = scmp.ne.s32.totalorder %s1244_s16, %s1240_s15 }
   0x7   : > { %s1316_s23 = scalar_select %p69_p0, %s1248_s17, %s71_s22  }
   0x8   : > { %p80_p4 = por %p79_p2, %p78_p1  ;;  %p1504_p5 = scmp.eq.s32.totalorder %s1303_s19, 0 }
   0x9   : > { %p1045_p6 = scmp.lt.s32.totalorder %s1252_s18, 2  ;;  %s170_s25 = sand.u32 1, %s1248_s17  }
   0xa   : > { %p1322_p7 = por %p1504_p5, %p84_p3  ;;  %s961_s26 = sshll.u32 %s170_s25, 9 }
   0xb   : > { %s1038_s27 = sshll.u32 %s1252_s18, 13  ;;  %s174_s5 = scalar_lea.vmem [#allocation3], %s961_s26 }
   0xc   : > { %s1331_s30 = scalar_lea.hbm %s1501_s2, %s1038_s27  ;;  %s181_s6 = sshll.u32 %s174_s5, 4  ;;  %s1333_s6 = int_to_ptr.vmem [resolvable:$true] %s181_s6 }
   0xd   : > { %p1335_p8 = pnand %p1045_p6, %p80_p4  ;;  %s1340_s8 = scalar_lea.sflag [#allocation4], %s170_s25 }
   0xe   : > { %s1188_s9 = scalar_lea.hbm %s1331_s30, 8192  ;;  %s1193_s12 = scalar_lea.hbm %s1501_s2, 16384 }
   0xf   : > { %p1189_p10 = scmp.ne.s32.totalorder %s1331_s30, %s1188_s9  ;;  %p1190_p11 = pneg %p1335_p8 }
  0x10   : > { %p1194_p0 = scmp.lt.u32.totalorder %s1331_s30, %s1501_s2  ;;  %p1195_p1 = scmp.lt.u32.totalorder %s1193_s12, %s1188_s9 }
  0x11   : > { %p1191_p12 = pnand %p1190_p11, %p1189_p10  ;;  %p1197_p3 = scmp.lt.u32.totalorder %s1188_s9, %s1331_s30 }
  0x12   : > { %p1196_p2 = por %p1195_p1, %p1194_p0 }
  0x13   : > { %p1192_p13 = pneg %p1191_p12 }
  0x14   : > { %p1198_p4 = por %p1197_p3, %p1196_p2 }
  0x16   : > { %p1199_p6 = pnand %p1198_p4, %p1192_p13 }
  0x18   : > { %1202 = shalt.err (!%p1199_p6)
}
  0x19   : > { %s1203_s15 = scalar_lea.vmem %s1333_s6, 8192  ;;  %s1254_s21 = smov [#allocation3]  }
  0x1a   : > { %p1204_p10 = scmp.ne.s32.totalorder %s1333_s6, %s1203_s15  ;;  %s1208_s22 = sshll.u32 %s1254_s21, 4  ;;  %s1209_s22 = int_to_ptr.vmem [resolvable:$false] %s1208_s22 }
  0x1b   : > { %s1210_s25 = scalar_lea.vmem %s1209_s22, 16384  ;;  %p1211_p9 = scmp.lt.s32.totalorder %s1333_s6, %s1209_s22 }
  0x1c   : > { %p1206_p12 = pnand %p1204_p10, %p1190_p11  ;;  %p1212_p0 = scmp.lt.s32.totalorder %s1210_s25, %s1203_s15 }
  0x1e   : > { %p1207_p5 = pneg %p1206_p12  ;;  %p1213_p1 = por %p1212_p0, %p1211_p9 }
  0x20   : > { %p1214_p2 = pnand %p1213_p1, %p1207_p5 }
  0x22   : > { %1217 = shalt.err (!%p1214_p2)
}
  0x23   : > { %s1255_s26 = smov 256   ;;  %s1256_s27 = smov 16  }
  0x24   : > { %1044 = dma.hbm_to_vmem [thread:$0]  (!%p1335_p8), %s1331_s30, 8192, %s1333_s6, %s1340_s8, %s1255_s26, %s1255_s26, %s1256_s27  }
  0x25   : > { %p196_p11 = scmp.lt.s32.totalorder %s1252_s18, 3  ;;  %p1507_p13 = scmp.ge.s32.totalorder %s1252_s18, 1 }
  0x27   : > { %p197_p3 = pnand %p1507_p13, %p196_p11 }
  0x28   : > { %s202_s28 = sand.u32 (!%p197_p3), 1, %s1244_s16  }
  0x29   : > { %200 = sbr.rel (%p197_p3) target bundleno = 393 (0x189), region = 36  ;;  %s965_s29 = sshll.u32 (!%p197_p3), %s202_s28, 9 }
  0x2a   : > { %s203_s5 = scalar_lea.sflag (!%p197_p3), [#allocation4], %s202_s28  ;;  %s1372_s9 = scalar_lea.vmem (!%p197_p3), [#allocation3], %s965_s29 }
  0x30   : > { %1235 = dma.done.wait (%p1322_p7), %s203_s5, 8192  }
  0x31   : > { %1237 = vsyncadd (%p1322_p7), %s203_s5, 4294959104  ;;  %p238_p5 = scmp.lt.s32.totalorder %s1303_s19, 1  ;;  %p969_p7 = scmp.ne.s32.totalorder %s1303_s19, 0 }
  0x32   : > { %v1257_v0 = vmov (!%p969_p7), 0  }
  0x33   : > { %s239_s30 = scalar_select %p238_p5, %s1303_s19, 1 }
  0x34   : > { %254 = sbr.rel (%p969_p7) target bundleno = 59 (0x3b), region = 44  ;;  %255 = vst [vmem:[#allocation2] sm:$0xf] (!%p969_p7), %v1257_v0 }
  0x35   : > { %s966_s6 = sshll.u32 %s239_s30, 3  ;;  %s967_s18 = sshll.u32 %s239_s30, 2 }
  0x36   : > { %s1383_s10 = scalar_lea.vmem %s1500_s1, %s966_s6  ;;  %s1388_s13 = scalar_lea.vmem %s1502_s3, %s967_s18 }
  0x37   : > { %s1393_s24 = scalar_lea.vmem %s1503_s4, %s966_s6 }
  0x3b PF: > { %v1082_v1 = vld [vmem:[%s1372_s9 + $0x104] ss:$16 sps:$4 sm:$0xff]   ;;  %v1084_v2 = vld [vmem:[%s1372_s9 + $0x10c] ss:$16 sps:$4 sm:$0xff]   ;;  %v1258_v3 = vmov 0   ;;  %p1508_p8 = scmp.eq.s32.totalorder %s1303_s19, 0 }
  0x3c   : > { %515 = vmatprep.mubr.bf16.mxu0 %v1258_v3  ;;  %556 = vmatprep.mubr.bf16.mxu1 %v1258_v3  ;;  %v1086_v4 = vld [vmem:[%s1372_s9 + $0x100] ss:$16 sps:$4 sm:$0xff]   ;;  %v1087_v5 = vld [vmem:[%s1372_s9 + $0x108] ss:$16 sps:$4 sm:$0xff]   ;;  %v1088_v6 = vld [vmem:[%s1372_s9 + $0x124] ss:$16 sps:$4 sm:$0xff]  }
  0x3d   : > { %483 = vmatprep.subr.bf16.mxu0 %v1082_v1  ;;  %524 = vmatprep.subr.bf16.mxu1 %v1084_v2  ;;  %v1090_v7 = vld [vmem:[%s1372_s9 + $0x12c] ss:$16 sps:$4 sm:$0xff]   ;;  %v1092_v8 = vld [vmem:[%s1372_s9 + $0x120] ss:$16 sps:$4 sm:$0xff]   ;;  %v1093_v9 = vld [vmem:[%s1372_s9 + $0x128] ss:$16 sps:$4 sm:$0xff]  }
  0x3e   : > { %484 = vmatpush1.bf16.msra.mxu0 %v1086_v4  ;;  %525 = vmatpush1.bf16.msra.mxu1 %v1087_v5  ;;  %v1094_v10 = vld [vmem:[%s1372_s9 + $0x144] ss:$16 sps:$4 sm:$0xff]   ;;  %v1096_v11 = vld [vmem:[%s1372_s9 + $0x14c] ss:$16 sps:$4 sm:$0xff]   ;;  %v1098_v12 = vld [vmem:[%s1372_s9 + $0x140] ss:$16 sps:$4 sm:$0xff]  }
  0x3f   : > { %485 = vmatprep.subr.bf16.mxu0 %v1088_v6  ;;  %526 = vmatprep.subr.bf16.mxu1 %v1090_v7  ;;  %v1099_v13 = vld [vmem:[%s1372_s9 + $0x148] ss:$16 sps:$4 sm:$0xff]   ;;  %v1100_v14 = vld [vmem:[%s1372_s9 + $0x164] ss:$16 sps:$4 sm:$0xff]   ;;  %v1102_v15 = vld [vmem:[%s1372_s9 + $0x16c] ss:$16 sps:$4 sm:$0xff]  }
  0x40   : > { %v1104_v16 = vld [vmem:[%s1372_s9 + $0x160] ss:$16 sps:$4 sm:$0xff]   ;;  %v1105_v17 = vld [vmem:[%s1372_s9 + $0x168] ss:$16 sps:$4 sm:$0xff]   ;;  %v1106_v18 = vld [vmem:[%s1372_s9 + $0x184] ss:$16 sps:$4 sm:$0xff]  }
  0x41   : > { %v1108_v19 = vld [vmem:[%s1372_s9 + $0x18c] ss:$16 sps:$4 sm:$0xff]   ;;  %v1110_v20 = vld [vmem:[%s1372_s9 + $0x180] ss:$16 sps:$4 sm:$0xff]   ;;  %v1111_v21 = vld [vmem:[%s1372_s9 + $0x188] ss:$16 sps:$4 sm:$0xff]  }
  0x42   : > { %486 = vmatpush1.bf16.msra.mxu0 %v1092_v8  ;;  %527 = vmatpush1.bf16.msra.mxu1 %v1093_v9  ;;  %v1112_v22 = vld [vmem:[%s1372_s9 + $0x1a4] ss:$16 sps:$4 sm:$0xff]   ;;  %v1114_v23 = vld [vmem:[%s1372_s9 + $0x1ac] ss:$16 sps:$4 sm:$0xff]   ;;  %v1116_v24 = vld [vmem:[%s1372_s9 + $0x1a0] ss:$16 sps:$4 sm:$0xff]  }
  0x43   : > { %487 = vmatprep.subr.bf16.mxu0 %v1094_v10  ;;  %528 = vmatprep.subr.bf16.mxu1 %v1096_v11  ;;  %v1117_v25 = vld [vmem:[%s1372_s9 + $0x1a8] ss:$16 sps:$4 sm:$0xff]   ;;  %v1118_v26 = vld [vmem:[%s1372_s9 + $0x1c4] ss:$16 sps:$4 sm:$0xff]   ;;  %v1120_v27 = vld [vmem:[%s1372_s9 + $0x1cc] ss:$16 sps:$4 sm:$0xff]  }
  0x44   : > { %v1122_v28 = vld [vmem:[%s1372_s9 + $0x1c0] ss:$16 sps:$4 sm:$0xff]   ;;  %v1123_v29 = vld [vmem:[%s1372_s9 + $0x1c8] ss:$16 sps:$4 sm:$0xff]   ;;  %v1124_v30 = vld [vmem:[%s1372_s9 + $0x1e4] ss:$16 sps:$4 sm:$0xff]  }
  0x45   : > { %v1126_v31 = vld [vmem:[%s1372_s9 + $0x1ec] ss:$16 sps:$4 sm:$0xff]   ;;  %v1128_v32 = vld [vmem:[%s1372_s9 + $0x1e0] ss:$16 sps:$4 sm:$0xff]   ;;  %v1129_v33 = vld [vmem:[%s1372_s9 + $0x1e8] ss:$16 sps:$4 sm:$0xff]  }
  0x46   : > { %488 = vmatpush1.bf16.msra.mxu0 %v1098_v12  ;;  %529 = vmatpush1.bf16.msra.mxu1 %v1099_v13  ;;  %v1431_v34 = vld [vmem:[%s1383_s10] sm:$0xff]  ;;  %v1132_v35 = vld [vmem:[%s1372_s9 + $0x4] ss:$16 sps:$4 sm:$0xff]   ;;  %v1133_v39 = vld [vmem:[%s1372_s9 + $0x8] ss:$16 sps:$4 sm:$0xff]   ;;  %v809_v13 = vlaneseq }
  0x47   : > { %489 = vmatprep.subr.bf16.mxu0 %v1100_v14  ;;  %530 = vmatprep.subr.bf16.mxu1 %v1102_v15  ;;  %v1135_v36 = vld [vmem:[%s1372_s9 + $0xc] ss:$16 sps:$4 sm:$0xff]   ;;  %v322_v37 = vpack.c.bf16 %v1431_v34, %v1431_v34  ;;  %v1130_v38 = vld [vmem:[%s1372_s9] ss:$16 sps:$4 sm:$0xff]   ;;  %v1138_v40 = vld [vmem:[%s1372_s9 + $0x24] ss:$16 sps:$4 sm:$0xff]  }
  0x48   : > { %v1141_v41 = vld [vmem:[%s1372_s9 + $0x2c] ss:$16 sps:$4 sm:$0xff]   ;;  %v1136_v42 = vld [vmem:[%s1372_s9 + $0x20] ss:$16 sps:$4 sm:$0xff]   ;;  %v1139_v43 = vld [vmem:[%s1372_s9 + $0x28] ss:$16 sps:$4 sm:$0xff]  }
  0x49   : > { %v1144_v44 = vld [vmem:[%s1372_s9 + $0x44] ss:$16 sps:$4 sm:$0xff]   ;;  %v1147_v45 = vld [vmem:[%s1372_s9 + $0x4c] ss:$16 sps:$4 sm:$0xff]   ;;  %v1142_v46 = vld [vmem:[%s1372_s9 + $0x40] ss:$16 sps:$4 sm:$0xff]  }
  0x4a   : > { %490 = vmatpush1.bf16.msra.mxu0 %v1104_v16  ;;  %531 = vmatpush1.bf16.msra.mxu1 %v1105_v17  ;;  %v1145_v47 = vld [vmem:[%s1372_s9 + $0x48] ss:$16 sps:$4 sm:$0xff]   ;;  %v1150_v48 = vld [vmem:[%s1372_s9 + $0x64] ss:$16 sps:$4 sm:$0xff]   ;;  %v1153_v49 = vld [vmem:[%s1372_s9 + $0x6c] ss:$16 sps:$4 sm:$0xff]  }
  0x4b   : > { %491 = vmatprep.subr.bf16.mxu0 %v1106_v18  ;;  %532 = vmatprep.subr.bf16.mxu1 %v1108_v19  ;;  %v1148_v50 = vld [vmem:[%s1372_s9 + $0x60] ss:$16 sps:$4 sm:$0xff]   ;;  %v1151_v51 = vld [vmem:[%s1372_s9 + $0x68] ss:$16 sps:$4 sm:$0xff]   ;;  %v1156_v52 = vld [vmem:[%s1372_s9 + $0x84] ss:$16 sps:$4 sm:$0xff]  }
  0x4c   : > { %v1159_v53 = vld [vmem:[%s1372_s9 + $0x8c] ss:$16 sps:$4 sm:$0xff]   ;;  %v1154_v54 = vld [vmem:[%s1372_s9 + $0x80] ss:$16 sps:$4 sm:$0xff]   ;;  %v1157_v55 = vld [vmem:[%s1372_s9 + $0x88] ss:$16 sps:$4 sm:$0xff]  }
  0x4d   : > { %v1162_v56 = vld [vmem:[%s1372_s9 + $0xa4] ss:$16 sps:$4 sm:$0xff]   ;;  %v1165_v57 = vld [vmem:[%s1372_s9 + $0xac] ss:$16 sps:$4 sm:$0xff]   ;;  %v1160_v58 = vld [vmem:[%s1372_s9 + $0xa0] ss:$16 sps:$4 sm:$0xff]  }
  0x4e   : > { %492 = vmatpush1.bf16.msra.mxu0 %v1110_v20  ;;  %533 = vmatpush1.bf16.msra.mxu1 %v1111_v21  ;;  %v1163_v59 = vld [vmem:[%s1372_s9 + $0xa8] ss:$16 sps:$4 sm:$0xff]   ;;  %v1168_v60 = vld [vmem:[%s1372_s9 + $0xc4] ss:$16 sps:$4 sm:$0xff]   ;;  %v1171_v61 = vld [vmem:[%s1372_s9 + $0xcc] ss:$16 sps:$4 sm:$0xff]  }
  0x4f   : > { %493 = vmatprep.subr.bf16.mxu0 %v1112_v22  ;;  %534 = vmatprep.subr.bf16.mxu1 %v1114_v23  ;;  %v1166_v62 = vld [vmem:[%s1372_s9 + $0xc0] ss:$16 sps:$4 sm:$0xff]   ;;  %v1169_v63 = vld [vmem:[%s1372_s9 + $0xc8] ss:$16 sps:$4 sm:$0xff]   ;;  %v1174_v0 = vld [vmem:[%s1372_s9 + $0xe4] ss:$16 sps:$4 sm:$0xff]  }
  0x50   : > { %v1177_v1 = vld [vmem:[%s1372_s9 + $0xec] ss:$16 sps:$4 sm:$0xff]   ;;  %v1172_v2 = vld [vmem:[%s1372_s9 + $0xe0] ss:$16 sps:$4 sm:$0xff]   ;;  %s833_s21 = scalar_select %p1508_p8, 1, 0 }
  0x51   : > { %v321_v4 = vld [vmem:[#allocation2] sm:$0xf]  ;;  %v810_v14 = vshrl.u32 %v809_v13, 7 }
  0x52   : > { %494 = vmatpush1.bf16.msra.mxu0 %v1116_v24  ;;  %535 = vmatpush1.bf16.msra.mxu1 %v1117_v25  ;;  %s834_s22 = scvt.s32.f32 %s833_s21  ;;  %v807_v16 = vld [vmem:[%s1388_s13] sm:$0xf] }
  0x53   : > { %495 = vmatprep.subr.bf16.mxu0 %v1118_v26  ;;  %536 = vmatprep.subr.bf16.mxu1 %v1120_v27  ;;  %v811_v15 = vsub.s32 0, %v810_v14  ;;  %v835_v17 = vld [vmem:[%s1499_s0] sm:$0xff]  ;;  %v815_v26 = vsub.s32 1, %v810_v14 }
  0x54   : > { %v839_v18 = vstv %s834_s22 }
  0x55   : > { %v812_v19 = vrot.slane %v807_v16, %v811_v15  ;;  %v840_v23 = vmul.f32 %v839_v18, %v835_v17 }
  0x56   : > { %496 = vmatpush1.bf16.msra.mxu0 %v1122_v28  ;;  %537 = vmatpush1.bf16.msra.mxu1 %v1123_v29 }
  0x57   : > { %497 = vmatprep.subr.bf16.mxu0 %v1124_v30  ;;  %538 = vmatprep.subr.bf16.mxu1 %v1126_v31 }
  0x5a   : > { %498 = vmatpush1.bf16.msra.mxu0 %v1128_v32  ;;  %539 = vmatpush1.bf16.msra.mxu1 %v1129_v33 }
  0x5b   : > { %725 = vmatprep.subr.bf16.mxu0 %v1132_v35  ;;  %766 = vmatprep.subr.bf16.mxu1 %v1135_v36 }
  0x5d   : > { %516 = vmatmul.mubr.bf16.vlgmr.msra.gmra.mrb[0].mxu0 %v322_v37  ;;  %557 = vmatmul.mubr.bf16.vlgmr.msra.gmra.mrb[0].mxu1 %v322_v37  ;;  %v816_v37 = vrot.slane %v807_v16, %v815_v26 }
  0x5e   : > { %726 = vmatpush1.bf16.msra.mxu0 %v1130_v38  ;;  %767 = vmatpush1.bf16.msra.mxu1 %v1133_v39  ;;  %v836_v38 = vld [vmem:[%s1499_s0 + $0x8] sm:$0xff] }
  0x5f   : > { %727 = vmatprep.subr.bf16.mxu0 %v1138_v40  ;;  %768 = vmatprep.subr.bf16.mxu1 %v1141_v41  ;;  %v841_v41 = vmul.f32 %v839_v18, %v836_v38 }
  0x60   : > { %757 = vmatprep.mubr.bf16.mxu0 %v1258_v3  ;;  %798 = vmatprep.mubr.bf16.mxu1 %v1258_v3  ;;  %v1175_v3 = vld [vmem:[%s1372_s9 + $0xe8] ss:$16 sps:$4 sm:$0xff]  }
  0x62   : > { %728 = vmatpush1.bf16.msra.mxu0 %v1136_v42  ;;  %769 = vmatpush1.bf16.msra.mxu1 %v1139_v43 }
  0x63   : > { %729 = vmatprep.subr.bf16.mxu0 %v1144_v44  ;;  %770 = vmatprep.subr.bf16.mxu1 %v1147_v45  ;;  %v823_v45 = vsub.s32 3, %v810_v14 }
  0x66   : > { %730 = vmatpush1.bf16.msra.mxu0 %v1142_v46  ;;  %771 = vmatpush1.bf16.msra.mxu1 %v1145_v47  ;;  %v819_v47 = vsub.s32 2, %v810_v14 }
  0x67   : > { %731 = vmatprep.subr.bf16.mxu0 %v1150_v48  ;;  %772 = vmatprep.subr.bf16.mxu1 %v1153_v49  ;;  %v824_v48 = vrot.slane %v807_v16, %v823_v45  ;;  %v838_v49 = vld [vmem:[%s1499_s0 + $0x18] sm:$0xff] }
  0x6a   : > { %732 = vmatpush1.bf16.msra.mxu0 %v1148_v50  ;;  %773 = vmatpush1.bf16.msra.mxu1 %v1151_v51  ;;  %v820_v50 = vrot.slane %v807_v16, %v819_v47  ;;  %v837_v51 = vld [vmem:[%s1499_s0 + $0x10] sm:$0xff] }
  0x6b   : > { %733 = vmatprep.subr.bf16.mxu0 %v1156_v52  ;;  %774 = vmatprep.subr.bf16.mxu1 %v1159_v53  ;;  %v843_v53 = vmul.f32 %v839_v18, %v838_v49 }
  0x6e   : > { %734 = vmatpush1.bf16.msra.mxu0 %v1154_v54  ;;  %775 = vmatpush1.bf16.msra.mxu1 %v1157_v55  ;;  %v842_v55 = vmul.f32 %v839_v18, %v837_v51 }
  0x6f   : > { %735 = vmatprep.subr.bf16.mxu0 %v1162_v56  ;;  %776 = vmatprep.subr.bf16.mxu1 %v1165_v57 }
  0x72   : > { %736 = vmatpush1.bf16.msra.mxu0 %v1160_v58  ;;  %777 = vmatpush1.bf16.msra.mxu1 %v1163_v59 }
  0x73   : > { %737 = vmatprep.subr.bf16.mxu0 %v1168_v60  ;;  %778 = vmatprep.subr.bf16.mxu1 %v1171_v61 }
  0x76   : > { %738 = vmatpush1.bf16.msra.mxu0 %v1166_v62  ;;  %779 = vmatpush1.bf16.msra.mxu1 %v1169_v63 }
  0x77   : > { %739 = vmatprep.subr.bf16.mxu0 %v1174_v0  ;;  %780 = vmatprep.subr.bf16.mxu1 %v1177_v1 }
  0x7a   : > { %740 = vmatpush1.bf16.msra.mxu0 %v1172_v2  ;;  %781 = vmatpush1.bf16.msra.mxu1 %v1175_v3 }
  0x7d   : > { %758 = vmatmul.mubr.bf16.vlgmr.msra.gmra.mrb[4].mxu0 %v321_v4  ;;  %799 = vmatmul.mubr.bf16.vlgmr.msra.gmra.mrb[4].mxu1 %v321_v4 }
 0x130   : > { %v517_v5 = vpop.f32.mrb[0].mxu0  ;;  %v558_v6 = vpop.f32.mrb[0].mxu1 }
 0x131   : > { %v519_v7 = vpop.f32.mrb[1].mxu0  ;;  %v560_v8 = vpop.f32.mrb[1].mxu1 }
 0x132   : > { %v521_v9 = vpop.f32.mrb[2].mxu0  ;;  %v562_v10 = vpop.f32.mrb[2].mxu1 }
 0x133   : > { %v522_v11 = vpop.f32.mrb[3].mxu0  ;;  %v563_v12 = vpop.f32.mrb[3].mxu1 }
 0x150   : > { %v759_v20 = vpop.f32.mrb[4].mxu0  ;;  %v800_v21 = vpop.f32.mrb[4].mxu1 }
 0x151   : > { %v760_v22 = vadd.f32 %v759_v20, %v517_v5  ;;  %v801_v24 = vadd.f32 %v800_v21, %v558_v6  ;;  %v761_v25 = vpop.f32.mrb[5].mxu0  ;;  %v802_v27 = vpop.f32.mrb[5].mxu1 }
 0x152   : > { %v762_v28 = vadd.f32 %v761_v25, %v519_v7  ;;  %v803_v29 = vadd.f32 %v802_v27, %v560_v8  ;;  %v763_v30 = vpop.f32.mrb[6].mxu0  ;;  %v804_v31 = vpop.f32.mrb[6].mxu1 }
 0x153   : > { %v829_v32 = vadd.f32 %v812_v19, %v760_v22  ;;  %v764_v33 = vpop.f32.mrb[7].mxu0  ;;  %v805_v35 = vpop.f32.mrb[7].mxu1  ;;  %v831_v54 = vadd.f32 %v820_v50, %v801_v24 }
 0x154   : > { %v830_v40 = vadd.f32 %v816_v37, %v762_v28  ;;  %v832_v52 = vadd.f32 %v824_v48, %v803_v29 }
 0x155   : > { %v844_v36 = vadd.f32 %v840_v23, %v829_v32  ;;  %v846_v59 = vadd.f32 %v842_v55, %v831_v54 }
 0x156   : > { %v845_v42 = vadd.f32 %v841_v41, %v830_v40  ;;  %v847_v57 = vadd.f32 %v843_v53, %v832_v52 }
 0x157   : > { %v1034_v39 = vmul.f32 -1.442695, %v844_v36 }
 0x158   : > { %v1035_v43 = vmul.f32 -1.442695, %v845_v42 }
 0x159   : > { %1178 = vpow2.f32 %v1034_v39 }
 0x15a   : > { %1180 = vpow2.f32 %v1035_v43 }
 0x163   : > { %v1179_v44 = vpop.eup %1178 }
 0x164   : > { %v851_v46 = vadd.f32 1.0, %v1179_v44  ;;  %v1181_v56 = vpop.eup %1180 }
 0x165   : > { %v857_v61 = vadd.f32 1.0, %v1181_v56 }
 0x166   : > { %1182 = vrcp.f32 %v851_v46 }
 0x170   : > { %v1183_v58 = vpop.eup %1182 }
 0x171   : > { %v860_v60 = vmul.f32 %v1183_v58, %v847_v57 }
 0x173   : > { %v861_v62 = vadd.f32 %v860_v60, %v846_v59 }
 0x175   : > { %1184 = vtanh.f32 %v861_v62 }
 0x176   : > { %1186 = vrcp.f32 %v857_v61 }
 0x17f   : > { %v1185_v63 = vpop.eup %1184 }
 0x180   : > { %v863_v0 = vsub.f32 %v1431_v34, %v1185_v63  ;;  %v1187_v1 = vpop.eup %1186 }
 0x182   : > { %v864_v2 = vmul.f32 %v1187_v1, %v863_v0 }
 0x184   : > { %v865_v3 = vadd.f32 %v1185_v63, %v864_v2 }
 0x186   : > { %866 = vst [vmem:[%s1393_s24] sm:$0xff] %v865_v3  ;;  %v867_v4 = vpack.c.bf16 %v865_v3, %v865_v3 }
 0x188   : > { %868 = vst [vmem:[#allocation2] sm:$0xf] %v867_v4 }
 0x189 PF: > { %p14_p9 = scmp.ge.s32.totalorder %s1306_s20, 4   ;;  %s1509_s15 = smov %s1244_s16 }
 0x18a   : > { %s1510_s16 = smov %s1248_s17  ;;  %s1511_s17 = smov %s1316_s23 }
 0x18b   : > { %s1512_s18 = smov %s1306_s20  ;;  %16 = sbr.rel (!%p14_p9) target bundleno = 3 (0x3), region = 86 }
 0x192   :  { %888 = vsyncpa [#allocation4], 1 }
 0x193   :  { %890 = vsyncpa [#allocation4 + $0x1], 1 }

</bundles_post_ra>
